<compile_context>
chip_gen: v7x
topology: tpu7x:2x2x1
jax: 0.10.0
libtpu: 0.0.40
codegen_flags: <defaults>
</compile_context>

<pallas_src>
import jax
import jax.numpy as jnp
from jax.experimental import pallas as pl
from jax.experimental.pallas import tpu as pltpu

SUBLANE = 8


def _round_up(n, m):
    return ((n + m - 1) // m) * m


def _feature_align():
    """MXU-tile padding granularity: 256 on v6e/v7x, 128 otherwise (v5e)."""
    try:
        kind = jax.devices()[0].device_kind.lower()
    except Exception:  # pragma: no cover - defensive
        kind = ""
    if ("v6" in kind) or ("v7" in kind) or ("7x" in kind):
        return 256
    return 128


def _is_v7x():
    try:
        kind = jax.devices()[0].device_kind.lower()
    except Exception:  # pragma: no cover - defensive
        kind = ""
    return ("v7" in kind) or ("7x" in kind)


def mlp_kernel(x_ref, w1_ref, b1_ref, w2_ref, b2_ref, w3_ref, b3_ref, o_ref,
               h1_ref, h2_ref):
    # Layer 1: bf16 matmul, f32 accumulation, fused f32 bias + ReLU epilogue,
    # result staged into explicit bf16 VMEM scratch (halves intermediate bytes).
    h1 = jnp.dot(x_ref[...], w1_ref[...], preferred_element_type=jnp.float32)
    h1_ref[...] = jnp.maximum(h1 + b1_ref[...], 0.0).astype(jnp.bfloat16)
    # Layer 2: Linear + ReLU.
    h2 = jnp.dot(h1_ref[...], w2_ref[...], preferred_element_type=jnp.float32)
    h2_ref[...] = jnp.maximum(h2 + b2_ref[...], 0.0).astype(jnp.bfloat16)
    # Layer 3: Linear (logits, no activation).
    out = jnp.dot(h2_ref[...], w3_ref[...], preferred_element_type=jnp.float32)
    o_ref[...] = (out + b3_ref[...]).astype(o_ref.dtype)


def _xla_forward(x, p):
    h1 = jnp.maximum(x @ p["w1"] + p["b1"], 0.0)
    h2 = jnp.maximum(h1 @ p["w2"] + p["b2"], 0.0)
    return h2 @ p["w3"] + p["b3"]


def neural_net_forward(x, params, *, force_pallas=False):
    """x: [B, input_size] float32. params: dict of f32 weights/biases."""
    w1, b1 = params["w1"], params["b1"]
    w2, b2 = params["w2"], params["b2"]
    w3, b3 = params["w3"], params["b3"]

    B, D_in = x.shape
    H = w1.shape[1]
    C = w3.shape[1]

    # Tiny problems (well under one MXU tile per layer) are pure launch/DMA
    # latency in Pallas - let XLA handle them unless the caller forces Pallas.
    if not force_pallas and (max(D_in, H, C) < 128 or B < 64):
        return _xla_forward(x, params)

    # Lane-dense padding of all feature dims (generation-aware granularity).
    ALIGN = _feature_align()
    D_in_p = _round_up(D_in, ALIGN)
    H_p = _round_up(H, ALIGN)
    C_p = _round_up(C, ALIGN)

    # Batch tile selection:
    #  * small B: single tile rounded to sublanes
    #  * 256 <= B < 512: TB=128 avoids padding B up to 512
    #  * very large B with modest weights: TB=512 amortizes grid-step overhead
    weight_bytes = (D_in_p * H_p + H_p * H_p + H_p * C_p) * 2  # bf16, Buffered(1)
    if B <= 256:
        TB = _round_up(B, SUBLANE)
    elif B < 512:
        TB = 128
    elif B >= 1024 and weight_bytes <= (8 << 20):
        TB = 512
    else:
        TB = 256
    B_p = _round_up(B, TB)

    def pad2(a, rows, cols):
        return jnp.pad(a, ((0, rows - a.shape[0]), (0, cols - a.shape[1])))

    # bf16 matmul operands (zero padding keeps the math exact for the logical
    # region: padded x columns / weight rows are zero, padded biases are zero).
    x_p = pad2(x, B_p, D_in_p).astype(jnp.bfloat16)
    w1_p = pad2(w1, D_in_p, H_p).astype(jnp.bfloat16)
    w2_p = pad2(w2, H_p, H_p).astype(jnp.bfloat16)
    w3_p = pad2(w3, H_p, C_p).astype(jnp.bfloat16)
    b1_p = pad2(b1, 1, H_p)  # biases stay f32
    b2_p = pad2(b2, 1, H_p)
    b3_p = pad2(b3, 1, C_p)

    grid = (B_p // TB,)

    # Weights / biases: constant index_map -> DMA'd once, kept VMEM-resident.
    # Buffered(1) avoids pointless double-buffering (halves weight VMEM).
    def resident(shape):
        return pl.BlockSpec(shape, lambda i: (0, 0), pipeline_mode=pl.Buffered(1))

    # Explicit VMEM budget: weights(x1) + biases + double-buffered x/out tiles
    # + bf16 intermediate scratch + f32 matmul results, with ~25% headroom.
    bias_bytes = (b1_p.size + b2_p.size + b3_p.size) * 4
    x_tile_bytes = 2 * TB * D_in_p * 2
    out_tile_bytes = 2 * TB * C_p * 4
    scratch_bytes = 2 * TB * H_p * 2
    interm_bytes = TB * (2 * H_p + C_p) * 4
    needed = (weight_bytes + bias_bytes + x_tile_bytes + out_tile_bytes
              + scratch_bytes + interm_bytes)
    vmem_cap = (64 << 20) if _is_v7x() else (100 << 20)
    vmem_limit = min(int(needed * 1.25) + (2 << 20), vmem_cap)
    # TODO(synk): if bf16 weights exceed the per-core VMEM budget (H >= ~4096
    # on v7x), add an N-tiling grid axis ("arbitrary") over the hidden dim or
    # split into per-layer pallas_calls; not needed for this module's sizes.

    flops = 2 * B_p * (D_in_p * H_p + H_p * H_p + H_p * C_p)
    bytes_accessed = (
        x_p.size * 2
        + (w1_p.size + w2_p.size + w3_p.size) * 2
        + (b1_p.size + b2_p.size + b3_p.size) * 4
        + B_p * C_p * 4
    )

    out_p = pl.pallas_call(
        mlp_kernel,
        out_shape=jax.ShapeDtypeStruct((B_p, C_p), jnp.float32),
        grid=grid,
        in_specs=[
            pl.BlockSpec((TB, D_in_p), lambda i: (i, 0)),  # x: tiled over batch
            resident((D_in_p, H_p)),                       # w1
            resident((1, H_p)),                            # b1
            resident((H_p, H_p)),                          # w2
            resident((1, H_p)),                            # b2
            resident((H_p, C_p)),                          # w3
            resident((1, C_p)),                            # b3
        ],
        out_specs=pl.BlockSpec((TB, C_p), lambda i: (i, 0)),
        scratch_shapes=[
            pltpu.VMEM((TB, H_p), jnp.bfloat16),  # relu(l1(x)) staging
            pltpu.VMEM((TB, H_p), jnp.bfloat16),  # relu(l2(.)) staging
        ],
        compiler_params=pltpu.CompilerParams(
            dimension_semantics=("parallel",),
            vmem_limit_bytes=vmem_limit),
        cost_estimate=pl.CostEstimate(
            flops=flops, transcendentals=0, bytes_accessed=bytes_accessed),
    )(x_p, w1_p, b1_p, w2_p, b2_p, w3_p, b3_p)

    # Slice back to the logical (unpadded) output.
    return out_p[:B, :C]


def init_params(key, input_size, hidden_size, num_classes):
    """Deterministic init mimicking torch.nn.Linear (uniform +/- 1/sqrt(fan_in))."""
    ks = jax.random.split(key, 6)

    def linear(kw, kb, fan_in, fan_out):
        bound = 1.0 / jnp.sqrt(fan_in)
        w = jax.random.uniform(kw, (fan_in, fan_out), jnp.float32, -bound, bound)
        b = jax.random.uniform(kb, (1, fan_out), jnp.float32, -bound, bound)
        return w, b

    w1, b1 = linear(ks[0], ks[1], input_size, hidden_size)
    w2, b2 = linear(ks[2], ks[3], hidden_size, hidden_size)
    w3, b3 = linear(ks[4], ks[5], hidden_size, num_classes)
    return {"w1": w1, "b1": b1, "w2": w2, "b2": b2, "w3": w3, "b3": b3}


def reference_forward(x, p):
    return _xla_forward(x, p)


if __name__ == "__main__":
    key = jax.random.PRNGKey(0)
    k_x, k_p = jax.random.split(key)

    batch, input_size, hidden_size, num_classes = 8, 32, 32, 8
    x = jax.random.normal(k_x, (batch, input_size), jnp.float32)
    params = init_params(k_p, input_size, hidden_size, num_classes)

    # Force the Pallas path so the kernel itself is exercised at demo size
    # (the wrapper would otherwise route this tiny shape to plain XLA).
    out = neural_net_forward(x, params, force_pallas=True)
    out = jax.block_until_ready(out)

    # f32 reference; bf16 matmul operands loosen the tolerance (documented).
    ref = reference_forward(x, params)
    assert out.shape == (batch, num_classes)
    assert jnp.allclose(out, ref, atol=2e-2, rtol=2e-2), (
        float(jnp.max(jnp.abs(out - ref))))

    print("KERNEL_OK")
</pallas_src>

<mosaic_0001>
module attributes {stable_mosaic.version = 11 : i64} {
  func.func @mlp_kernel(%arg0: i32, %arg1: memref<8x128xbf16, #tpu.memory_space<vmem>>, %arg2: memref<128x128xbf16, #tpu.memory_space<vmem>>, %arg3: memref<1x128xf32, #tpu.memory_space<vmem>>, %arg4: memref<128x128xbf16, #tpu.memory_space<vmem>>, %arg5: memref<1x128xf32, #tpu.memory_space<vmem>>, %arg6: memref<128x128xbf16, #tpu.memory_space<vmem>>, %arg7: memref<1x128xf32, #tpu.memory_space<vmem>>, %arg8: memref<8x128xf32, #tpu.memory_space<vmem>>, %arg9: memref<8x128xbf16, #tpu.memory_space<vmem>>, %arg10: memref<8x128xbf16, #tpu.memory_space<vmem>>) attributes {dimension_semantics = [#tpu.dimension_semantics<parallel>], iteration_bounds = array<i64: 1>, scalar_prefetch = 0 : i64, scratch_operands = 2 : i64, tpu.core_type = #tpu.core_type<tc>, window_params = [{transform_indices = @transform_0, window_bounds = array<i64: 8, 128>}, {pipeline_mode = #tpu.pipeline_mode<synchronous>, transform_indices = @transform_1, window_bounds = array<i64: 128, 128>}, {pipeline_mode = #tpu.pipeline_mode<synchronous>, transform_indices = @transform_2, window_bounds = array<i64: 1, 128>}, {pipeline_mode = #tpu.pipeline_mode<synchronous>, transform_indices = @transform_3, window_bounds = array<i64: 128, 128>}, {pipeline_mode = #tpu.pipeline_mode<synchronous>, transform_indices = @transform_4, window_bounds = array<i64: 1, 128>}, {pipeline_mode = #tpu.pipeline_mode<synchronous>, transform_indices = @transform_5, window_bounds = array<i64: 128, 128>}, {pipeline_mode = #tpu.pipeline_mode<synchronous>, transform_indices = @transform_6, window_bounds = array<i64: 1, 128>}, {transform_indices = @transform_7, window_bounds = array<i64: 8, 128>}]} {
    %c0 = arith.constant 0 : index
    %c0_0 = arith.constant 0 : index
    %0 = vector.load %arg1[%c0, %c0_0] : memref<8x128xbf16, #tpu.memory_space<vmem>>, vector<8x128xbf16>
    %c0_1 = arith.constant 0 : index
    %c0_2 = arith.constant 0 : index
    %1 = vector.load %arg2[%c0_1, %c0_2] : memref<128x128xbf16, #tpu.memory_space<vmem>>, vector<128x128xbf16>
    %cst = arith.constant dense<0.000000e+00> : vector<8x128xf32>
    %2 = tpu.matmul %0, %1, %cst {dimension_numbers = #tpu.dot_dimension_numbers<[1], [0], [0], [1], [0, 0, 1, 1], [], []>} : vector<8x128xbf16>, vector<128x128xbf16>, vector<8x128xf32> -> vector<8x128xf32>
    %c0_3 = arith.constant 0 : index
    %c0_4 = arith.constant 0 : index
    %3 = vector.load %arg3[%c0_3, %c0_4] : memref<1x128xf32, #tpu.memory_space<vmem>>, vector<1x128xf32>
    %4 = vector.broadcast %3 : vector<1x128xf32> to vector<8x128xf32>
    %5 = arith.addf %2, %4 : vector<8x128xf32>
    %cst_5 = arith.constant 0.000000e+00 : f32
    %6 = vector.broadcast %cst_5 : f32 to vector<8x128xf32>
    %7 = arith.maximumf %5, %6 : vector<8x128xf32>
    %8 = arith.truncf %7 : vector<8x128xf32> to vector<8x128xbf16>
    %c0_6 = arith.constant 0 : index
    %c0_7 = arith.constant 0 : index
    %9 = vector.load %arg9[%c0_6, %c0_7] : memref<8x128xbf16, #tpu.memory_space<vmem>>, vector<8x128xbf16>
    tpu.vector_store %arg9[%c0_6, %c0_7], %8 {strides = array<i32>} : memref<8x128xbf16, #tpu.memory_space<vmem>>, vector<8x128xbf16>,
    %c0_8 = arith.constant 0 : index
    %c0_9 = arith.constant 0 : index
    %10 = vector.load %arg9[%c0_8, %c0_9] : memref<8x128xbf16, #tpu.memory_space<vmem>>, vector<8x128xbf16>
    %c0_10 = arith.constant 0 : index
    %c0_11 = arith.constant 0 : index
    %11 = vector.load %arg4[%c0_10, %c0_11] : memref<128x128xbf16, #tpu.memory_space<vmem>>, vector<128x128xbf16>
    %cst_12 = arith.constant dense<0.000000e+00> : vector<8x128xf32>
    %12 = tpu.matmul %10, %11, %cst_12 {dimension_numbers = #tpu.dot_dimension_numbers<[1], [0], [0], [1], [0, 0, 1, 1], [], []>} : vector<8x128xbf16>, vector<128x128xbf16>, vector<8x128xf32> -> vector<8x128xf32>
    %c0_13 = arith.constant 0 : index
    %c0_14 = arith.constant 0 : index
    %13 = vector.load %arg5[%c0_13, %c0_14] : memref<1x128xf32, #tpu.memory_space<vmem>>, vector<1x128xf32>
    %14 = vector.broadcast %13 : vector<1x128xf32> to vector<8x128xf32>
    %15 = arith.addf %12, %14 : vector<8x128xf32>
    %cst_15 = arith.constant 0.000000e+00 : f32
    %16 = vector.broadcast %cst_15 : f32 to vector<8x128xf32>
    %17 = arith.maximumf %15, %16 : vector<8x128xf32>
    %18 = arith.truncf %17 : vector<8x128xf32> to vector<8x128xbf16>
    %c0_16 = arith.constant 0 : index
    %c0_17 = arith.constant 0 : index
    %19 = vector.load %arg10[%c0_16, %c0_17] : memref<8x128xbf16, #tpu.memory_space<vmem>>, vector<8x128xbf16>
    tpu.vector_store %arg10[%c0_16, %c0_17], %18 {strides = array<i32>} : memref<8x128xbf16, #tpu.memory_space<vmem>>, vector<8x128xbf16>,
    %c0_18 = arith.constant 0 : index
    %c0_19 = arith.constant 0 : index
    %20 = vector.load %arg10[%c0_18, %c0_19] : memref<8x128xbf16, #tpu.memory_space<vmem>>, vector<8x128xbf16>
    %c0_20 = arith.constant 0 : index
    %c0_21 = arith.constant 0 : index
    %21 = vector.load %arg6[%c0_20, %c0_21] : memref<128x128xbf16, #tpu.memory_space<vmem>>, vector<128x128xbf16>
    %cst_22 = arith.constant dense<0.000000e+00> : vector<8x128xf32>
    %22 = tpu.matmul %20, %21, %cst_22 {dimension_numbers = #tpu.dot_dimension_numbers<[1], [0], [0], [1], [0, 0, 1, 1], [], []>} : vector<8x128xbf16>, vector<128x128xbf16>, vector<8x128xf32> -> vector<8x128xf32>
    %c0_23 = arith.constant 0 : index
    %c0_24 = arith.constant 0 : index
    %23 = vector.load %arg7[%c0_23, %c0_24] : memref<1x128xf32, #tpu.memory_space<vmem>>, vector<1x128xf32>
    %24 = vector.broadcast %23 : vector<1x128xf32> to vector<8x128xf32>
    %25 = arith.addf %22, %24 : vector<8x128xf32>
    %c0_25 = arith.constant 0 : index
    %c0_26 = arith.constant 0 : index
    %26 = vector.load %arg8[%c0_25, %c0_26] : memref<8x128xf32, #tpu.memory_space<vmem>>, vector<8x128xf32>
    tpu.vector_store %arg8[%c0_25, %c0_26], %25 {strides = array<i32>} : memref<8x128xf32, #tpu.memory_space<vmem>>, vector<8x128xf32>,
    return
  }
  func.func @transform_0(%arg0: i32) -> (i32, i32) {
    %c0_i32 = arith.constant 0 : i32
    %c0_i32_0 = arith.constant 0 : i32
    return %arg0, %c0_i32 : i32, i32
  }
  func.func @transform_1(%arg0: i32) -> (i32, i32) {
    %c0_i32 = arith.constant 0 : i32
    %c0_i32_0 = arith.constant 0 : i32
    %c0_i32_1 = arith.constant 0 : i32
    return %c0_i32, %c0_i32_0 : i32, i32
  }
  func.func @transform_2(%arg0: i32) -> (i32, i32) {
    %c0_i32 = arith.constant 0 : i32
    %c0_i32_0 = arith.constant 0 : i32
    %c0_i32_1 = arith.constant 0 : i32
    return %c0_i32, %c0_i32_0 : i32, i32
  }
  func.func @transform_3(%arg0: i32) -> (i32, i32) {
    %c0_i32 = arith.constant 0 : i32
    %c0_i32_0 = arith.constant 0 : i32
    %c0_i32_1 = arith.constant 0 : i32
    return %c0_i32, %c0_i32_0 : i32, i32
  }
  func.func @transform_4(%arg0: i32) -> (i32, i32) {
    %c0_i32 = arith.constant 0 : i32
    %c0_i32_0 = arith.constant 0 : i32
    %c0_i32_1 = arith.constant 0 : i32
    return %c0_i32, %c0_i32_0 : i32, i32
  }
  func.func @transform_5(%arg0: i32) -> (i32, i32) {
    %c0_i32 = arith.constant 0 : i32
    %c0_i32_0 = arith.constant 0 : i32
    %c0_i32_1 = arith.constant 0 : i32
    return %c0_i32, %c0_i32_0 : i32, i32
  }
  func.func @transform_6(%arg0: i32) -> (i32, i32) {
    %c0_i32 = arith.constant 0 : i32
    %c0_i32_0 = arith.constant 0 : i32
    %c0_i32_1 = arith.constant 0 : i32
    return %c0_i32, %c0_i32_0 : i32, i32
  }
  func.func @transform_7(%arg0: i32) -> (i32, i32) {
    %c0_i32 = arith.constant 0 : i32
    %c0_i32_0 = arith.constant 0 : i32
    return %arg0, %c0_i32 : i32, i32
  }
}

</mosaic_0001>

<bundles_post_ra>
// kernel: tpu_custom_call.1
= control target key start
LH: loop header
LB: loop body
LE: loop exit
PB: predicated region body
PF: predicated region fallthrough
CT: control target
= control target key end

     0   :  { %12 = vsyncpa [#allocation5], 0  ;;  %s863_s0 = inlined_call_operand.hbm [shape: bf16[8,128], index: 0, kind: input, shape index: {}]   ;;  %s864_s1 = inlined_call_operand.hbm [shape: bf16[128,128], index: 1, kind: input, shape index: {}]   ;;  %s865_s2 = inlined_call_operand.vmem [shape: f32[1,128], index: 2, kind: input, shape index: {}]   ;;  %s866_s3 = inlined_call_operand.hbm [shape: bf16[128,128], index: 3, kind: input, shape index: {}]   ;;  %s867_s4 = inlined_call_operand.vmem [shape: f32[1,128], index: 4, kind: input, shape index: {}]   ;;  %s868_s5 = inlined_call_operand.hbm [shape: bf16[128,128], index: 5, kind: input, shape index: {}]   ;;  %s869_s6 = inlined_call_operand.vmem [shape: f32[1,128], index: 6, kind: input, shape index: {}]   ;;  %s870_s7 = inlined_call_operand.hbm [shape: f32[8,128], index: 7, kind: output, shape index: {}]  }
   0x1   :  { %13 = vsyncpa [#allocation8], 0 }
   0x2   :  { %14 = vsyncpa [#allocation11], 0 }
   0x3   :  { %15 = vsyncpa [#allocation6], 0  ;;  %s706_s24 = smov [#allocation7]   ;;  %s588_s28 = scalar_lea.hbm %s864_s1, 1024 }
   0x4   :  { %s31_s25 = sshll.u32 %s706_s24, 4  ;;  %p589_p0 = scmp.ne.s32.totalorder %s864_s1, %s588_s28  ;;  %s32_s25 = int_to_ptr.vmem [resolvable:$true] %s31_s25 }
   0x5   :  { %p592_p1 = scmp.lt.u32.totalorder %s588_s28, %s864_s1 }
   0x7   :  { %p594_p2 = pnand %p592_p1, %p589_p0 }
   0x9   :  { %597 = shalt.err (!%p594_p2)
}
   0xa   :  { %s598_s10 = scalar_lea.vmem %s32_s25, 1024  ;;  %p603_p4 = scmp.lt.s32.totalorder %s32_s25, %s32_s25 }
   0xb   :  { %p599_p3 = scmp.ne.s32.totalorder %s32_s25, %s598_s10  ;;  %p604_p5 = scmp.lt.s32.totalorder %s598_s10, %s598_s10 }
   0xd   :  { %p605_p6 = por %p604_p5, %p603_p4 }
   0xf   :  { %p606_p7 = pnand %p605_p6, %p599_p3 }
  0x11   :  { %609 = shalt.err (!%p606_p7)
}
  0x12   :  { %s707_s11 = smov 64   ;;  %s708_s12 = smov 4  }
  0x13   :  { %37 = dma.hbm_to_vmem [thread:$0]  %s864_s1, 1024, %s32_s25, [#allocation8], %s707_s11, %s707_s11, %s708_s12  }
  0x14   :  { %s709_s15 = smov [#allocation4]   ;;  %s710_s17 = smov [#allocation9]  }
  0x15   :  { %s22_s16 = sshll.u32 %s709_s15, 4  ;;  %s45_s18 = sshll.u32 %s710_s17, 4  ;;  %s23_s16 = int_to_ptr.vmem [resolvable:$true] %s22_s16  ;;  %s46_s18 = int_to_ptr.vmem [resolvable:$true] %s45_s18 }
  0x16   :  { %s610_s21 = scalar_lea.hbm %s863_s0, 64 }
  0x17   :  { %p611_p8 = scmp.ne.s32.totalorder %s863_s0, %s610_s21  ;;  %p614_p9 = scmp.lt.u32.totalorder %s610_s21, %s863_s0 }
  0x19   :  { %p616_p10 = pnand %p614_p9, %p611_p8 }
  0x1b   :  { %619 = shalt.err (!%p616_p10)
}
  0x1c   :  { %s620_s1 = scalar_lea.vmem %s23_s16, 64  ;;  %p625_p12 = scmp.lt.s32.totalorder %s23_s16, %s23_s16 }
  0x1d   :  { %p621_p11 = scmp.ne.s32.totalorder %s23_s16, %s620_s1  ;;  %p626_p13 = scmp.lt.s32.totalorder %s620_s1, %s620_s1 }
  0x1f   :  { %p627_p0 = por %p626_p13, %p625_p12 }
  0x21   :  { %p628_p1 = pnand %p627_p0, %p621_p11 }
  0x23   :  { %631 = shalt.err (!%p628_p1)
}
  0x24   :  { %25 = dma.hbm_to_vmem [thread:$0]  %s863_s0, 64, %s23_s16, [#allocation5]  }
  0x25   :  { %s632_s30 = scalar_lea.hbm %s866_s3, 1024 }
  0x26   :  { %p633_p2 = scmp.ne.s32.totalorder %s866_s3, %s632_s30  ;;  %p636_p3 = scmp.lt.u32.totalorder %s632_s30, %s866_s3 }
  0x28   :  { %p638_p4 = pnand %p636_p3, %p633_p2 }
  0x2a   :  { %641 = shalt.err (!%p638_p4)
}
  0x2b   :  { %s642_s14 = scalar_lea.vmem %s46_s18, 1024  ;;  %p647_p6 = scmp.lt.s32.totalorder %s46_s18, %s46_s18 }
  0x2c   :  { %p643_p5 = scmp.ne.s32.totalorder %s46_s18, %s642_s14  ;;  %p648_p7 = scmp.lt.s32.totalorder %s642_s14, %s642_s14 }
  0x2e   :  { %p649_p8 = por %p648_p7, %p647_p6 }
  0x30   :  { %p650_p9 = pnand %p649_p8, %p643_p5 }
  0x32   :  { %653 = shalt.err (!%p650_p9)
}
  0x33   :  { %51 = dma.hbm_to_vmem [thread:$0]  %s866_s3, 1024, %s46_s18, [#allocation8], %s707_s11, %s707_s11, %s708_s12  }
  0x34   :  { %s711_s16 = smov [#allocation10]   ;;  %s654_s21 = scalar_lea.hbm %s868_s5, 1024 }
  0x35   :  { %s59_s17 = sshll.u32 %s711_s16, 4  ;;  %p655_p10 = scmp.ne.s32.totalorder %s868_s5, %s654_s21  ;;  %s60_s17 = int_to_ptr.vmem [resolvable:$true] %s59_s17 }
  0x36   :  { %p658_p11 = scmp.lt.u32.totalorder %s654_s21, %s868_s5 }
  0x38   :  { %p660_p12 = pnand %p658_p11, %p655_p10 }
  0x3a   :  { %663 = shalt.err (!%p660_p12)
}
  0x3b   :  { %s664_s1 = scalar_lea.vmem %s60_s17, 1024  ;;  %p669_p0 = scmp.lt.s32.totalorder %s60_s17, %s60_s17 }
  0x3c   :  { %p665_p13 = scmp.ne.s32.totalorder %s60_s17, %s664_s1  ;;  %p670_p1 = scmp.lt.s32.totalorder %s664_s1, %s664_s1 }
  0x3e   :  { %p671_p2 = por %p670_p1, %p669_p0 }
  0x40   :  { %p672_p3 = pnand %p671_p2, %p665_p13 }
  0x42   :  { %675 = shalt.err (!%p672_p3)
}
  0x43   :  { %65 = dma.hbm_to_vmem [thread:$0]  %s868_s5, 1024, %s60_s17, [#allocation11], %s707_s11, %s707_s11, %s708_s12  }
  0x44   :  { %698 = dma.done.wait [#allocation5], 64  }
  0x45   :  { %699 = vsyncadd [#allocation5], 4294967232 }
  0x46   :  { %700 = dma.done.wait [#allocation8], 2048  }
  0x47   :  { %701 = vsyncadd [#allocation8], 4294965248 }
  0x48   :  { %702 = dma.done.wait [#allocation11], 1024  }
  0x49   :  { %703 = vsyncadd [#allocation11], 4294966272  ;;  %v712_v0 = vmov 0.0   ;;  %vm713_vm0 = vmmov 0   ;;  %v564_v1 = vld [vmem:[#allocation7] sm:$0xff]   ;;  %v565_v2 = vld [vmem:[#allocation7 + $0x8] sm:$0xff]  }
  0x4a   :  { %495 = vmatprep.subr.bf16.mxu0 %v712_v0  ;;  %511 = vmatprep.mubr.msk.bf16.mxu0 %vm713_vm0, %v712_v0  ;;  %v566_v3 = vld [vmem:[#allocation7 + $0x10] sm:$0xff]   ;;  %v572_v4 = vld [vmem:[#allocation9] sm:$0xff]   ;;  %v567_v5 = vld [vmem:[#allocation7 + $0x18] sm:$0xff]   ;;  %s714_s28 = smov [#allocation12]  }
  0x4b   :  { %515 = vmatprep.subr.bf16.mxu1 %v712_v0  ;;  %531 = vmatprep.mubr.msk.bf16.mxu1 %vm713_vm0, %v712_v0  ;;  %v573_v6 = vld [vmem:[#allocation9 + $0x8] sm:$0xff]   ;;  %v568_v7 = vld [vmem:[#allocation7 + $0x20] sm:$0xff]   ;;  %v574_v8 = vld [vmem:[#allocation9 + $0x10] sm:$0xff]   ;;  %s430_s29 = sshll.u32 %s714_s28, 4  ;;  %s431_s29 = int_to_ptr.vmem [resolvable:$true] %s430_s29 }
  0x4c   :  { %496 = vmatpush3.bf16.msra.mxu0 %v564_v1  ;;  %516 = vmatpush3.bf16.msra.mxu1 %v572_v4  ;;  %v569_v9 = vld [vmem:[#allocation7 + $0x28] sm:$0xff]   ;;  %v575_v10 = vld [vmem:[#allocation9 + $0x18] sm:$0xff]   ;;  %v570_v11 = vld [vmem:[#allocation7 + $0x30] sm:$0xff]   ;;  %p681_p5 = scmp.lt.s32.totalorder %s431_s29, %s431_s29 }
  0x4d   :  { %497 = vmatprep.subr.bf16.mxu0 %v712_v0  ;;  %517 = vmatprep.subr.bf16.mxu1 %v712_v0  ;;  %v571_v12 = vld [vmem:[#allocation7 + $0x38] sm:$0xff]   ;;  %v576_v14 = vld [vmem:[#allocation9 + $0x20] sm:$0xff]   ;;  %v577_v15 = vld [vmem:[#allocation9 + $0x28] sm:$0xff]  }
  0x4e   :  { %v81_v13 = vld [vmem:[#allocation4] sm:$0xf]  ;;  %v578_v16 = vld [vmem:[#allocation9 + $0x30] sm:$0xff]   ;;  %v580_v18 = vld [vmem:[#allocation10] sm:$0xff]  }
  0x4f   :  { %v579_v17 = vld [vmem:[#allocation9 + $0x38] sm:$0xff]   ;;  %v581_v19 = vld [vmem:[#allocation10 + $0x8] sm:$0xff]   ;;  %v582_v20 = vld [vmem:[#allocation10 + $0x10] sm:$0xff]  }
  0x50   :  { %498 = vmatpush3.bf16.msra.mxu0 %v565_v2  ;;  %518 = vmatpush3.bf16.msra.mxu1 %v573_v6  ;;  %v583_v21 = vld [vmem:[#allocation10 + $0x18] sm:$0xff]   ;;  %v441_v22 = vld [vmem:[%s865_s2] ss:$0 sm:$0xff]  ;;  %v584_v31 = vld [vmem:[#allocation10 + $0x20] sm:$0xff]  }
  0x51   :  { %499 = vmatprep.subr.bf16.mxu0 %v712_v0  ;;  %519 = vmatprep.subr.bf16.mxu1 %v712_v0  ;;  %v585_v32 = vld [vmem:[#allocation10 + $0x28] sm:$0xff]   ;;  %v586_v33 = vld [vmem:[#allocation10 + $0x30] sm:$0xff]   ;;  %v587_v34 = vld [vmem:[#allocation10 + $0x38] sm:$0xff]  }
  0x52   :  { %v450_v35 = vld [vmem:[%s867_s4] ss:$0 sm:$0xff]  ;;  %s676_s4 = scalar_lea.vmem %s431_s29, 128 }
  0x53   :  { %v459_v44 = vld [vmem:[%s869_s6] ss:$0 sm:$0xff]  ;;  %p677_p4 = scmp.ne.s32.totalorder %s431_s29, %s676_s4  ;;  %p682_p6 = scmp.lt.s32.totalorder %s676_s4, %s676_s4 }
  0x54   :  { %500 = vmatpush3.bf16.msra.mxu0 %v566_v3  ;;  %520 = vmatpush3.bf16.msra.mxu1 %v574_v8 }
  0x55   :  { %501 = vmatprep.subr.bf16.mxu0 %v712_v0  ;;  %521 = vmatprep.subr.bf16.mxu1 %v712_v0  ;;  %p683_p7 = por %p682_p6, %p681_p5 }
  0x57   :  { %p684_p8 = pnand %p683_p7, %p677_p4 }
  0x58   :  { %502 = vmatpush3.bf16.msra.mxu0 %v567_v5  ;;  %522 = vmatpush3.bf16.msra.mxu1 %v575_v10 }
  0x59   :  { %503 = vmatprep.subr.bf16.mxu0 %v712_v0  ;;  %523 = vmatprep.subr.bf16.mxu1 %v712_v0 }
  0x5c   :  { %504 = vmatpush3.bf16.msra.mxu0 %v568_v7  ;;  %524 = vmatpush3.bf16.msra.mxu1 %v576_v14 }
  0x5d   :  { %505 = vmatprep.subr.bf16.mxu0 %v712_v0  ;;  %525 = vmatprep.subr.bf16.mxu1 %v712_v0 }
  0x60   :  { %506 = vmatpush3.bf16.msra.mxu0 %v569_v9  ;;  %526 = vmatpush3.bf16.msra.mxu1 %v577_v15 }
  0x61   :  { %507 = vmatprep.subr.bf16.mxu0 %v712_v0  ;;  %527 = vmatprep.subr.bf16.mxu1 %v712_v0 }
  0x64   :  { %508 = vmatpush3.bf16.msra.mxu0 %v570_v11  ;;  %528 = vmatpush3.bf16.msra.mxu1 %v578_v16 }
  0x65   :  { %509 = vmatprep.subr.bf16.mxu0 %v712_v0  ;;  %529 = vmatprep.subr.bf16.mxu1 %v712_v0 }
  0x68   :  { %510 = vmatpush3.bf16.msra.mxu0 %v571_v12  ;;  %530 = vmatpush3.bf16.msra.mxu1 %v579_v17 }
  0x69   :  { %535 = vmatprep.subr.bf16.mxu0 %v712_v0 }
  0x6b   :  { %512 = vmatmul.mubr.bf16.vlgmr.msra.gmra.mrb[0].mxu0 %v81_v13 }
  0x6c   :  { %551 = vmatprep.mubr.msk.bf16.mxu0 %vm713_vm0, %v712_v0  ;;  %536 = vmatpush3.bf16.msra.mxu0 %v580_v18 }
  0x6d   :  { %537 = vmatprep.subr.bf16.mxu0 %v712_v0 }
  0x70   :  { %538 = vmatpush3.bf16.msra.mxu0 %v581_v19 }
  0x71   :  { %539 = vmatprep.subr.bf16.mxu0 %v712_v0 }
  0x74   :  { %540 = vmatpush3.bf16.msra.mxu0 %v582_v20 }
  0x75   :  { %541 = vmatprep.subr.bf16.mxu0 %v712_v0 }
  0x78   :  { %542 = vmatpush3.bf16.msra.mxu0 %v583_v21 }
  0x79   :  { %543 = vmatprep.subr.bf16.mxu0 %v712_v0 }
  0x7c   :  { %544 = vmatpush3.bf16.msra.mxu0 %v584_v31 }
  0x7d   :  { %545 = vmatprep.subr.bf16.mxu0 %v712_v0 }
  0x80   :  { %546 = vmatpush3.bf16.msra.mxu0 %v585_v32 }
  0x81   :  { %547 = vmatprep.subr.bf16.mxu0 %v712_v0 }
  0x84   :  { %548 = vmatpush3.bf16.msra.mxu0 %v586_v33 }
  0x85   :  { %549 = vmatprep.subr.bf16.mxu0 %v712_v0 }
  0x88   :  { %550 = vmatpush3.bf16.msra.mxu0 %v587_v34 }
 0x13e   :  { %v187_v23 = vpop.f32.mrb[0].mxu0 }
 0x13f   :  { %v188_v24 = vadd.f32 %v441_v22, %v187_v23  ;;  %v513_v25 = vpop.f32.mrb[1].mxu0 }
 0x140   :  { %v190_v26 = vpop.f32.mrb[2].mxu0 }
 0x141   :  { %v193_v27 = vmax.f32 %v188_v24, 0.0  ;;  %v514_v28 = vpop.f32.mrb[3].mxu0 }
 0x143   :  { %v194_v29 = vpack.c.bf16 %v193_v27, %v193_v27 }
 0x145   :  { %195 = vst [vmem:[#allocation2] sm:$0xf] %v194_v29 }
 0x14c   :  { %v196_v30 = vld [vmem:[#allocation2] sm:$0xf] }
 0x14d   :  { %532 = vmatmul.mubr.bf16.vlgmr.msra.gmra.mrb[0].mxu1 %v196_v30 }
 0x220   :  { %v302_v36 = vpop.f32.mrb[0].mxu1 }
 0x221   :  { %v303_v37 = vadd.f32 %v450_v35, %v302_v36  ;;  %v533_v38 = vpop.f32.mrb[1].mxu1 }
 0x222   :  { %v305_v39 = vpop.f32.mrb[2].mxu1 }
 0x223   :  { %v308_v40 = vmax.f32 %v303_v37, 0.0  ;;  %v534_v41 = vpop.f32.mrb[3].mxu1 }
 0x225   :  { %v309_v42 = vpack.c.bf16 %v308_v40, %v308_v40 }
 0x227   :  { %310 = vst [vmem:[#allocation3] sm:$0xf] %v309_v42 }
 0x22e   :  { %v311_v43 = vld [vmem:[#allocation3] sm:$0xf] }
 0x22f   :  { %552 = vmatmul.mubr.bf16.vlgmr.msra.gmra.mrb[4].mxu0 %v311_v43 }
 0x302   :  { %v417_v45 = vpop.f32.mrb[4].mxu0 }
 0x303   :  { %v418_v46 = vadd.f32 %v459_v44, %v417_v45  ;;  %v553_v47 = vpop.f32.mrb[5].mxu0 }
 0x304   :  { %v420_v48 = vpop.f32.mrb[6].mxu0 }
 0x305   :  { %423 = vst [vmem:[#allocation12] sm:$0xff] %v418_v46  ;;  %v554_v49 = vpop.f32.mrb[7].mxu0 }
 0x306   :  { %687 = shalt.err (!%p684_p8)
}
 0x307   :  { %s688_s6 = scalar_lea.hbm %s870_s7, 128 }
 0x308   :  { %p689_p9 = scmp.ne.s32.totalorder %s870_s7, %s688_s6  ;;  %p692_p10 = scmp.lt.u32.totalorder %s688_s6, %s870_s7 }
 0x30a   :  { %p694_p11 = pnand %p692_p10, %p689_p9 }
 0x30c   :  { %697 = shalt.err (!%p694_p11)
}
 0x30d   :  { %433 = dma.vmem_to_hbm [thread:$0]  %s431_s29, 128, %s870_s7, [#allocation6]  }
 0x30e   :  { %704 = dma.done.wait [#allocation6], 128  }
 0x30f   :  { %705 = vsyncadd [#allocation6], 4294967168 }
 0x310   :  { %437 = vsyncpa [#allocation5], 1 }
 0x311   :  { %438 = vsyncpa [#allocation8], 1 }
 0x312   :  { %439 = vsyncpa [#allocation11], 1 }
 0x313   :  { %440 = vsyncpa [#allocation6], 1 }

</bundles_post_ra>
